<compile_context>
chip_gen: v6e
topology: v6e:2x2x1
jax: 0.10.0
libtpu: 0.0.40
codegen_flags: <defaults>
</compile_context>

<pallas_src>
import functools

import jax
import jax.numpy as jnp
from jax.experimental import pallas as pl
from jax.experimental.pallas import tpu as pltpu

# TODO(synk): nn.Dropout is identity at inference; training-mode stochastic
# dropout would use pltpu.prng_seed / pltpu.stateful_bernoulli, omitted here.
# TODO(synk): production H should be a multiple of 128 (lane-dense stores);
# odd H (like the toy H=32 test shape) is correct but uses masked vst.


# ---------------------------------------------------------------------------
# Kernels
# ---------------------------------------------------------------------------

def _self_output_resident_kernel(x_ref, res_ref, w_ref, b_ref, g_ref, beta_ref,
                                 o_ref, *, eps: float):
    # x_ref:   (tm, H)  block of flattened hidden_states
    # res_ref: (tm, H)  residual (input_tensor) block
    # w_ref:   (H, H)   dense weight, (in, out) layout, VMEM-resident
    # b/g/beta:(1, H)   bias / LN gamma / LN beta, VMEM-resident
    h = jnp.dot(x_ref[...], w_ref[...], preferred_element_type=jnp.float32)
    y = h + b_ref[...].astype(jnp.float32) + res_ref[...].astype(jnp.float32)

    mean = jnp.mean(y, axis=-1, keepdims=True)
    centered = y - mean
    var = jnp.mean(centered * centered, axis=-1, keepdims=True)
    normed = centered * jax.lax.rsqrt(var + eps)

    out = normed * g_ref[...].astype(jnp.float32) + beta_ref[...].astype(jnp.float32)
    o_ref[...] = out.astype(o_ref.dtype)


def _self_output_streaming_kernel(x_ref, res_ref, w_ref, b_ref, g_ref, beta_ref,
                                  o_ref, acc_ref, *, eps: float):
    # Weight streamed along the contraction (K) axis:
    # x_ref: (tm, tk), w_ref: (tk, H), acc_ref: (tm, H) f32 scratch.
    k = pl.program_id(1)

    @pl.when(k == 0)
    def _():
        acc_ref[...] = jnp.zeros_like(acc_ref)

    acc_ref[...] += jnp.dot(x_ref[...], w_ref[...],
                            preferred_element_type=jnp.float32)

    @pl.when(k == pl.num_programs(1) - 1)
    def _():
        y = (acc_ref[...] + b_ref[...].astype(jnp.float32)
             + res_ref[...].astype(jnp.float32))
        mean = jnp.mean(y, axis=-1, keepdims=True)
        centered = y - mean
        var = jnp.mean(centered * centered, axis=-1, keepdims=True)
        normed = centered * jax.lax.rsqrt(var + eps)
        out = (normed * g_ref[...].astype(jnp.float32)
               + beta_ref[...].astype(jnp.float32))
        o_ref[...] = out.astype(o_ref.dtype)


# ---------------------------------------------------------------------------
# Wrapper
# ---------------------------------------------------------------------------

def _round_up(x: int, m: int) -> int:
    return (x + m - 1) // m * m


def _round_down(x: int, m: int) -> int:
    return (x // m) * m


def _vmem_capacity_bytes() -> int:
    try:
        return int(pltpu.get_tpu_info().vmem_capacity_bytes)
    except Exception:
        return 128 << 20  # v5e/v6e default


def gn_self_output_forward(hidden_states, input_tensor, params, *,
                           eps: float = 1e-12, tile_m: int = 512):
    """hidden_states, input_tensor: [B, S, H] -> returns [B, S, H].

    params must contain:
      dense_w_t: (H, H) weight already in (in, out) layout (pre-transposed)
      dense_b:   (H,)
      ln_w:      (H,)
      ln_b:      (H,)
    """
    B, S, H = hidden_states.shape
    M = B * S
    act_dtype = hidden_states.dtype
    act_bytes = jnp.dtype(act_dtype).itemsize

    # Weight in (in, out) layout; keep it in the activation dtype so the MXU
    # runs its native path (no-op when prepare_params already cast it).
    w_t = params["dense_w_t"]
    if w_t.dtype != act_dtype:
        w_t = w_t.astype(act_dtype)
    w_bytes = jnp.dtype(w_t.dtype).itemsize

    b = params["dense_b"].reshape(1, H)
    gamma = params["ln_w"].reshape(1, H)
    beta = params["ln_b"].reshape(1, H)

    x2d = hidden_states.reshape(M, H)
    r2d = input_tensor.reshape(M, H)

    # --- per-generation VMEM budget (v7x: 64 MiB/TC, v5e/v6e: 128 MiB).
    capacity = _vmem_capacity_bytes()
    vmem_budget = int(min(capacity * 0.78, capacity - (8 << 20)))

    weight_bytes = H * H * w_bytes
    small_vec_bytes = 4 * 2 * H * 4  # bias / gamma / beta (+ slack)

    # Requested row tile (clamped to the problem size, sublane-aligned).
    tm_req = max(8, min(_round_up(tile_m, 8), _round_up(M, 8)))

    # Resident-weight path footprint per row: x/res/out double-buffered tiles
    # plus ~3 f32 intermediates (dot accumulator + LayerNorm temporaries).
    per_row_resident = H * (3 * 2 * act_bytes + 3 * 4)
    resident_rows = 0
    if vmem_budget > weight_bytes + small_vec_bytes:
        resident_rows = (vmem_budget - weight_bytes - small_vec_bytes) // per_row_resident

    # Contraction tile for the streaming fallback (must divide H exactly so no
    # garbage K-padding contaminates the accumulation).
    tk = next((t for t in (2048, 1024, 512, 256, 128) if t <= H and H % t == 0),
              None)

    use_streaming = (resident_rows < min(tm_req, 128)) and tk is not None

    cost_flops = 2 * M * H * H
    cost_transc = M  # one rsqrt per row

    if not use_streaming:
        tm = tm_req
        if resident_rows > 0:
            tm = max(8, min(tm, _round_down(int(resident_rows), 8)))
        grid = (pl.cdiv(M, tm),)

        cost = pl.CostEstimate(
            flops=cost_flops,
            transcendentals=cost_transc,
            bytes_accessed=3 * M * H * act_bytes + weight_bytes + small_vec_bytes,
        )

        out2d = pl.pallas_call(
            functools.partial(_self_output_resident_kernel, eps=eps),
            out_shape=jax.ShapeDtypeStruct((M, H), act_dtype),
            grid_spec=pltpu.PrefetchScalarGridSpec(
                num_scalar_prefetch=0,
                grid=grid,
                in_specs=[
                    pl.BlockSpec((tm, H), lambda i: (i, 0)),            # x block
                    pl.BlockSpec((tm, H), lambda i: (i, 0)),            # residual block
                    pl.BlockSpec(memory_space=pltpu.MemorySpace.VMEM),  # weight (resident)
                    pl.BlockSpec(memory_space=pltpu.MemorySpace.VMEM),  # bias
                    pl.BlockSpec(memory_space=pltpu.MemorySpace.VMEM),  # gamma
                    pl.BlockSpec(memory_space=pltpu.MemorySpace.VMEM),  # beta
                ],
                out_specs=pl.BlockSpec((tm, H), lambda i: (i, 0)),
            ),
            compiler_params=pltpu.CompilerParams(
                dimension_semantics=("parallel",),
                vmem_limit_bytes=int(vmem_budget),
            ),
            cost_estimate=cost,
        )(x2d, r2d, w_t, b, gamma, beta)
    else:
        # Streaming-weight path: weight tiles (tk, H) are pipelined along a
        # trailing "arbitrary" grid axis; res/out stay resident per row tile.
        stream_fixed = 2 * tk * H * w_bytes + small_vec_bytes
        per_row_stream = (2 * tk * act_bytes          # x tile, double-buffered
                          + H * (2 * 2 * act_bytes    # res + out, double-buffered
                                 + 4                  # f32 accumulator scratch
                                 + 2 * 4))            # LN f32 temporaries
        stream_rows = 8
        if vmem_budget > stream_fixed:
            stream_rows = (vmem_budget - stream_fixed) // per_row_stream
        tm = max(8, min(tm_req, _round_down(int(stream_rows), 8)))
        grid = (pl.cdiv(M, tm), H // tk)

        cost = pl.CostEstimate(
            flops=cost_flops,
            transcendentals=cost_transc,
            bytes_accessed=(3 * M * H * act_bytes
                            + weight_bytes * grid[0] + small_vec_bytes),
        )

        out2d = pl.pallas_call(
            functools.partial(_self_output_streaming_kernel, eps=eps),
            out_shape=jax.ShapeDtypeStruct((M, H), act_dtype),
            grid_spec=pltpu.PrefetchScalarGridSpec(
                num_scalar_prefetch=0,
                grid=grid,
                in_specs=[
                    pl.BlockSpec((tm, tk), lambda i, k: (i, k)),        # x block
                    pl.BlockSpec((tm, H), lambda i, k: (i, 0)),         # residual block
                    pl.BlockSpec((tk, H), lambda i, k: (k, 0)),         # weight tile (streamed)
                    pl.BlockSpec(memory_space=pltpu.MemorySpace.VMEM),  # bias
                    pl.BlockSpec(memory_space=pltpu.MemorySpace.VMEM),  # gamma
                    pl.BlockSpec(memory_space=pltpu.MemorySpace.VMEM),  # beta
                ],
                out_specs=pl.BlockSpec((tm, H), lambda i, k: (i, 0)),
                scratch_shapes=[pltpu.VMEM((tm, H), jnp.float32)],
            ),
            compiler_params=pltpu.CompilerParams(
                dimension_semantics=("parallel", "arbitrary"),
                vmem_limit_bytes=int(vmem_budget),
            ),
            cost_estimate=cost,
        )(x2d, r2d, w_t, b, gamma, beta)

    return out2d.reshape(B, S, H)


# ---------------------------------------------------------------------------
# Parameters / reference
# ---------------------------------------------------------------------------

def init_params(key, hidden_size):
    """Creates params in PyTorch layout (dense_w is (out, in))."""
    k1, k2, _ = jax.random.split(key, 3)
    bound = 1.0 / (hidden_size ** 0.5)
    dense_w = jax.random.uniform(k1, (hidden_size, hidden_size),
                                 jnp.float32, -bound, bound)
    dense_b = jax.random.uniform(k2, (hidden_size,), jnp.float32, -bound, bound)
    ln_w = jnp.ones((hidden_size,), jnp.float32)
    ln_b = jnp.zeros((hidden_size,), jnp.float32)
    return {"dense_w": dense_w, "dense_b": dense_b, "ln_w": ln_w, "ln_b": ln_b}


def prepare_params(params, compute_dtype=None):
    """One-time prep: transpose the weight into (in, out) layout (no .T in the
    hot path) and optionally cast it to the activation/compute dtype so the
    MXU runs its native (e.g. bf16) path."""
    out = dict(params)
    w_t = jnp.asarray(params["dense_w"]).T
    if compute_dtype is not None:
        w_t = w_t.astype(compute_dtype)
    out["dense_w_t"] = w_t.copy()
    return out


def reference_forward(hidden_states, input_tensor, params, eps=1e-12):
    h = jnp.einsum("bsh,oh->bso", hidden_states, params["dense_w"]) + params["dense_b"]
    y = h + input_tensor
    mean = jnp.mean(y, axis=-1, keepdims=True)
    var = jnp.mean((y - mean) ** 2, axis=-1, keepdims=True)
    return (y - mean) * jax.lax.rsqrt(var + eps) * params["ln_w"] + params["ln_b"]


if __name__ == "__main__":
    B, S, H = 2, 8, 32
    eps = 1e-12

    key = jax.random.PRNGKey(0)
    kx, kr, kp = jax.random.split(key, 3)
    hidden_states = jax.random.normal(kx, (B, S, H), jnp.float32)
    input_tensor = jax.random.normal(kr, (B, S, H), jnp.float32)

    params = prepare_params(init_params(kp, H), compute_dtype=hidden_states.dtype)

    out = gn_self_output_forward(hidden_states, input_tensor, params, eps=eps)
    out = jax.block_until_ready(out)

    ref = reference_forward(hidden_states, input_tensor, params, eps=eps)
    assert out.shape == (B, S, H)
    assert jnp.allclose(out, ref, atol=1e-5, rtol=1e-5), "mismatch vs reference"

    print("KERNEL_OK")
</pallas_src>

<mosaic_0001>
module attributes {stable_mosaic.version = 11 : i64} {
  func.func @_self_output_resident_kernel(%arg0: i32, %arg1: memref<16x32xf32, #tpu.memory_space<vmem>>, %arg2: memref<16x32xf32, #tpu.memory_space<vmem>>, %arg3: memref<32x32xf32, #tpu.memory_space<vmem>>, %arg4: memref<1x32xf32, #tpu.memory_space<vmem>>, %arg5: memref<1x32xf32, #tpu.memory_space<vmem>>, %arg6: memref<1x32xf32, #tpu.memory_space<vmem>>, %arg7: memref<16x32xf32, #tpu.memory_space<vmem>>) attributes {dimension_semantics = [#tpu.dimension_semantics<parallel>], iteration_bounds = array<i64: 1>, scalar_prefetch = 0 : i64, scratch_operands = 0 : i64, tpu.core_type = #tpu.core_type<tc>, window_params = [{transform_indices = @transform_0, window_bounds = array<i64: 16, 32>}, {transform_indices = @transform_1, window_bounds = array<i64: 16, 32>}, {pipeline_mode = #tpu.pipeline_mode<synchronous>, transform_indices = @transform_2, window_bounds = array<i64: 32, 32>}, {pipeline_mode = #tpu.pipeline_mode<synchronous>, transform_indices = @transform_3, window_bounds = array<i64: 1, 32>}, {pipeline_mode = #tpu.pipeline_mode<synchronous>, transform_indices = @transform_4, window_bounds = array<i64: 1, 32>}, {pipeline_mode = #tpu.pipeline_mode<synchronous>, transform_indices = @transform_5, window_bounds = array<i64: 1, 32>}, {transform_indices = @transform_6, window_bounds = array<i64: 16, 32>}]} {
    %c0 = arith.constant 0 : index
    %c0_0 = arith.constant 0 : index
    %0 = vector.load %arg1[%c0, %c0_0] : memref<16x32xf32, #tpu.memory_space<vmem>>, vector<16x32xf32>
    %c0_1 = arith.constant 0 : index
    %c0_2 = arith.constant 0 : index
    %1 = vector.load %arg3[%c0_1, %c0_2] : memref<32x32xf32, #tpu.memory_space<vmem>>, vector<32x32xf32>
    %cst = arith.constant dense<0.000000e+00> : vector<16x32xf32>
    %2 = tpu.matmul %0, %1, %cst {dimension_numbers = #tpu.dot_dimension_numbers<[1], [0], [0], [1], [0, 0, 1, 1], [], []>} : vector<16x32xf32>, vector<32x32xf32>, vector<16x32xf32> -> vector<16x32xf32>
    %c0_3 = arith.constant 0 : index
    %c0_4 = arith.constant 0 : index
    %3 = vector.load %arg4[%c0_3, %c0_4] : memref<1x32xf32, #tpu.memory_space<vmem>>, vector<1x32xf32>
    %4 = vector.broadcast %3 : vector<1x32xf32> to vector<16x32xf32>
    %5 = arith.addf %2, %4 : vector<16x32xf32>
    %c0_5 = arith.constant 0 : index
    %c0_6 = arith.constant 0 : index
    %6 = vector.load %arg2[%c0_5, %c0_6] : memref<16x32xf32, #tpu.memory_space<vmem>>, vector<16x32xf32>
    %7 = arith.addf %5, %6 : vector<16x32xf32>
    %cst_7 = arith.constant dense<0.000000e+00> : vector<16xf32>
    %8 = vector.multi_reduction <add>, %7, %cst_7 [1] : vector<16x32xf32> to vector<16xf32>
    %9 = vector.shape_cast %8 : vector<16xf32> to vector<16x1xf32>
    %cst_8 = arith.constant 3.200000e+01 : f32
    %10 = vector.broadcast %cst_8 : f32 to vector<16x1xf32>
    %11 = arith.divf %9, %10 : vector<16x1xf32>
    %12 = vector.broadcast %11 : vector<16x1xf32> to vector<16x32xf32>
    %13 = arith.subf %7, %12 : vector<16x32xf32>
    %14 = arith.mulf %13, %13 : vector<16x32xf32>
    %cst_9 = arith.constant dense<0.000000e+00> : vector<16xf32>
    %15 = vector.multi_reduction <add>, %14, %cst_9 [1] : vector<16x32xf32> to vector<16xf32>
    %16 = vector.shape_cast %15 : vector<16xf32> to vector<16x1xf32>
    %cst_10 = arith.constant 3.200000e+01 : f32
    %17 = vector.broadcast %cst_10 : f32 to vector<16x1xf32>
    %18 = arith.divf %16, %17 : vector<16x1xf32>
    %cst_11 = arith.constant 9.99999996E-13 : f32
    %19 = vector.broadcast %cst_11 : f32 to vector<16x1xf32>
    %20 = arith.addf %18, %19 : vector<16x1xf32>
    %21 = math.rsqrt %20 : vector<16x1xf32>
    %22 = vector.broadcast %21 : vector<16x1xf32> to vector<16x32xf32>
    %23 = arith.mulf %13, %22 : vector<16x32xf32>
    %c0_12 = arith.constant 0 : index
    %c0_13 = arith.constant 0 : index
    %24 = vector.load %arg5[%c0_12, %c0_13] : memref<1x32xf32, #tpu.memory_space<vmem>>, vector<1x32xf32>
    %25 = vector.broadcast %24 : vector<1x32xf32> to vector<16x32xf32>
    %26 = arith.mulf %23, %25 : vector<16x32xf32>
    %c0_14 = arith.constant 0 : index
    %c0_15 = arith.constant 0 : index
    %27 = vector.load %arg6[%c0_14, %c0_15] : memref<1x32xf32, #tpu.memory_space<vmem>>, vector<1x32xf32>
    %28 = vector.broadcast %27 : vector<1x32xf32> to vector<16x32xf32>
    %29 = arith.addf %26, %28 : vector<16x32xf32>
    %c0_16 = arith.constant 0 : index
    %c0_17 = arith.constant 0 : index
    %30 = vector.load %arg7[%c0_16, %c0_17] : memref<16x32xf32, #tpu.memory_space<vmem>>, vector<16x32xf32>
    tpu.vector_store %arg7[%c0_16, %c0_17], %29 {strides = array<i32>} : memref<16x32xf32, #tpu.memory_space<vmem>>, vector<16x32xf32>,
    return
  }
  func.func @transform_0(%arg0: i32) -> (i32, i32) {
    %c0_i32 = arith.constant 0 : i32
    %c0_i32_0 = arith.constant 0 : i32
    return %arg0, %c0_i32 : i32, i32
  }
  func.func @transform_1(%arg0: i32) -> (i32, i32) {
    %c0_i32 = arith.constant 0 : i32
    %c0_i32_0 = arith.constant 0 : i32
    return %arg0, %c0_i32 : i32, i32
  }
  func.func @transform_2(%arg0: i32) -> (i32, i32) {
    %c0_i32 = arith.constant 0 : i32
    %c0_i32_0 = arith.constant 0 : i32
    %c0_i32_1 = arith.constant 0 : i32
    return %c0_i32, %c0_i32_0 : i32, i32
  }
  func.func @transform_3(%arg0: i32) -> (i32, i32) {
    %c0_i32 = arith.constant 0 : i32
    %c0_i32_0 = arith.constant 0 : i32
    %c0_i32_1 = arith.constant 0 : i32
    return %c0_i32, %c0_i32_0 : i32, i32
  }
  func.func @transform_4(%arg0: i32) -> (i32, i32) {
    %c0_i32 = arith.constant 0 : i32
    %c0_i32_0 = arith.constant 0 : i32
    %c0_i32_1 = arith.constant 0 : i32
    return %c0_i32, %c0_i32_0 : i32, i32
  }
  func.func @transform_5(%arg0: i32) -> (i32, i32) {
    %c0_i32 = arith.constant 0 : i32
    %c0_i32_0 = arith.constant 0 : i32
    %c0_i32_1 = arith.constant 0 : i32
    return %c0_i32, %c0_i32_0 : i32, i32
  }
  func.func @transform_6(%arg0: i32) -> (i32, i32) {
    %c0_i32 = arith.constant 0 : i32
    %c0_i32_0 = arith.constant 0 : i32
    return %arg0, %c0_i32 : i32, i32
  }
}

</mosaic_0001>

<bundles_post_ra>
// kernel: tpu_custom_call.1
= control target key start
LH: loop header
LB: loop body
LE: loop exit
PB: predicated region body
PF: predicated region fallthrough
CT: control target
= control target key end

     0   :  { %11 = vsyncpa [#allocation3], 0  ;;  %s429_s0 = inlined_call_operand.hbm [shape: f32[16,32], index: 0, kind: input, shape index: {}]   ;;  %s430_s1 = inlined_call_operand.hbm [shape: f32[16,32], index: 1, kind: input, shape index: {}]   ;;  %s431_s2 = inlined_call_operand.hbm [shape: f32[32,32], index: 2, kind: input, shape index: {}]   ;;  %s432_s3 = inlined_call_operand.vmem [shape: f32[1,32], index: 3, kind: input, shape index: {}]   ;;  %s433_s4 = inlined_call_operand.vmem [shape: f32[1,32], index: 4, kind: input, shape index: {}]   ;;  %s434_s5 = inlined_call_operand.vmem [shape: f32[1,32], index: 5, kind: input, shape index: {}]   ;;  %s435_s6 = inlined_call_operand.hbm [shape: f32[16,32], index: 6, kind: output, shape index: {}]  }
   0x1   :  { %12 = vsyncpa [#allocation6], 0 }
   0x2   :  { %13 = vsyncpa [#allocation4], 0  ;;  %s347_s21 = smov [#allocation5]   ;;  %s348_s23 = smov [#allocation2]  }
   0x3   :  { %s31_s22 = sshll.u32 %s347_s21, 4  ;;  %s19_s24 = sshll.u32 %s348_s23, 4  ;;  %s32_s22 = int_to_ptr.vmem [resolvable:$true] %s31_s22  ;;  %s20_s24 = int_to_ptr.vmem [resolvable:$true] %s19_s24 }
   0x4   :  { %s269_s25 = scalar_lea.vmem %s32_s22, 256  ;;  %p274_p1 = scmp.lt.s32.totalorder %s32_s22, %s32_s22 }
   0x5   :  { %p270_p0 = scmp.ne.s32.totalorder %s32_s22, %s269_s25  ;;  %p275_p2 = scmp.lt.s32.totalorder %s269_s25, %s269_s25 }
   0x7   :  { %p276_p3 = por %p275_p2, %p274_p1 }
   0x9   :  { %p277_p4 = pnand %p276_p3, %p270_p0 }
   0xb   :  { %280 = shalt.err (!%p277_p4)
}
   0xc   :  { %s349_s26 = smov 128   ;;  %s350_s27 = smov 8  }
   0xd   :  { %37 = dma.hbm_to_vmem [thread:$0]  %s430_s1, 256, %s32_s22, [#allocation6], %s349_s26, %s349_s26, %s350_s27  }
   0xe   :  { %s289_s30 = scalar_lea.vmem %s20_s24, 256  ;;  %p294_p6 = scmp.lt.s32.totalorder %s20_s24, %s20_s24 }
   0xf   :  { %p290_p5 = scmp.ne.s32.totalorder %s20_s24, %s289_s30  ;;  %p295_p7 = scmp.lt.s32.totalorder %s289_s30, %s289_s30 }
  0x11   :  { %p296_p8 = por %p295_p7, %p294_p6 }
  0x13   :  { %p297_p9 = pnand %p296_p8, %p290_p5 }
  0x15   :  { %300 = shalt.err (!%p297_p9)
}
  0x16   :  { %25 = dma.hbm_to_vmem [thread:$0]  %s429_s0, 256, %s20_s24, [#allocation3], %s349_s26, %s349_s26, %s350_s27  }
  0x17   :  { %s351_s9 = smov [#allocation7]  }
  0x18   :  { %s43_s10 = sshll.u32 %s351_s9, 4  ;;  %s44_s10 = int_to_ptr.vmem [resolvable:$true] %s43_s10 }
  0x19   :  { %s309_s11 = scalar_lea.vmem %s44_s10, 512  ;;  %p314_p11 = scmp.lt.s32.totalorder %s44_s10, %s44_s10 }
  0x1a   :  { %p310_p10 = scmp.ne.s32.totalorder %s44_s10, %s309_s11  ;;  %p315_p12 = scmp.lt.s32.totalorder %s309_s11, %s309_s11 }
  0x1c   :  { %p316_p13 = por %p315_p12, %p314_p11 }
  0x1e   :  { %p317_p0 = pnand %p316_p13, %p310_p10 }
  0x20   :  { %320 = shalt.err (!%p317_p0)
}
  0x21   :  { %49 = dma.hbm_to_vmem [thread:$0]  %s431_s2, 512, %s44_s10, [#allocation6], %s349_s26, %s349_s26, %s350_s27  }
  0x22   :  { %341 = dma.done.wait [#allocation3], 256  }
  0x23   :  { %342 = vsyncadd [#allocation3], 4294967040 }
  0x24   :  { %343 = dma.done.wait [#allocation6], 768  }
  0x25   :  { %344 = vsyncadd [#allocation6], 4294966528  ;;  %vm78_vm0 = vcmask 261120   ;;  %v70_v0 = vld [vmem:[#allocation7 + $0x18] sm:$0xff]  ;;  %v69_v1 = vld [vmem:[#allocation7 + $0x10] sm:$0xff]  ;;  %s352_s16 = smov [#allocation8]  }
  0x26   :  { %240 = vmatprep.subr.mxu0 %v70_v0  ;;  %v65_v2 = vld [vmem:[#allocation2] sm:$0xff]  ;;  %v68_v3 = vld [vmem:[#allocation7 + $0x8] sm:$0xff]  ;;  %v160_v9 = vld [vmem:[#allocation5] sm:$0xff]  ;;  %s216_s17 = sshll.u32 %s352_s16, 4  ;;  %s217_s17 = int_to_ptr.vmem [resolvable:$true] %s216_s17 }
  0x27   :  { %241 = vmatpush3.msra.mxu0 %v70_v0  ;;  %248 = vmatprep.mubr.msk.f32.mxu0 %vm78_vm0, %v65_v2  ;;  %v67_v4 = vld [vmem:[#allocation7] sm:$0xff]  ;;  %v66_v5 = vld [vmem:[#allocation2 + $0x8] sm:$0xff]  ;;  %v161_v12 = vld [vmem:[#allocation5 + $0x8] sm:$0xff]  ;;  %s321_s18 = scalar_lea.vmem %s217_s17, 256  ;;  %p326_p2 = scmp.lt.s32.totalorder %s217_s17, %s217_s17 }
  0x28   :  { %242 = vmatprep.subr.mxu0 %v69_v1  ;;  %v229_v7 = vld [vmem:[%s432_s3] ss:$0 sm:$0xff]  ;;  %p322_p1 = scmp.ne.s32.totalorder %s217_s17, %s321_s18  ;;  %p327_p3 = scmp.lt.s32.totalorder %s321_s18, %s321_s18 }
  0x29   :  { %243 = vmatpush3.msra.mxu0 %v69_v1  ;;  %v232_v34 = vld [vmem:[%s433_s4] ss:$0 sm:$0xff] }
  0x2a   :  { %244 = vmatprep.subr.mxu0 %v68_v3  ;;  %v233_v36 = vld [vmem:[%s434_s5] ss:$0 sm:$0xff]  ;;  %p328_p4 = por %p327_p3, %p326_p2 }
  0x2b   :  { %245 = vmatpush3.msra.mxu0 %v68_v3 }
  0x2c   :  { %246 = vmatprep.subr.mxu0 %v67_v4  ;;  %p329_p5 = pnand %p328_p4, %p322_p1 }
  0x2d   :  { %247 = vmatpush3.msra.mxu0 %v67_v4 }
  0x2e   :  { %249 = vmatmul.mubr.msk.f32.vlgmr.msra.gmra.mxu0 %vm78_vm0, %v66_v5 }
  0xee   :  { %v250_v6 = vpop.f32.mrf.mxu0 }
  0xef   :  { %v157_v10 = vadd.f32 %v250_v6, %v229_v7 }
  0xf0   :  { %v151_v8 = vpop.f32.mrf.mxu0 }
  0xf1   :  { %v152_v11 = vadd.f32 %v229_v7, %v151_v8  ;;  %v163_v15 = vadd.f32 %v161_v12, %v157_v10 }
  0xf3   :  { %v162_v13 = vadd.f32 %v160_v9, %v152_v11  ;;  %v167_v16 = vsel %vm78_vm0, %v163_v15, 0.0 }
  0xf5   :  { %v164_v14 = vsel %vm78_vm0, %v162_v13, 0.0 }
  0xf6   :  { %165 = vadd.xlane.f32.xlu0 %v164_v14 }
  0xfa   :  { %168 = vadd.xlane.f32.xlu0 %v167_v16 }
 0x17f   :  { %v166_v17 = vpop.xlane.xlu0 %165 }
 0x180   :  { %v171_v18 = vmul.f32 0.03125, %v166_v17 }
 0x182   :  { %v173_v19 = vsub.f32 %v162_v13, %v171_v18 }
 0x183   :  { %v169_v20 = vpop.xlane.xlu0 %168 }
 0x184   :  { %v172_v21 = vmul.f32 0.03125, %v169_v20  ;;  %v175_v22 = vmul.f32 %v173_v19, %v173_v19 }
 0x186   :  { %v174_v23 = vsub.f32 %v163_v15, %v172_v21  ;;  %v177_v24 = vsel %vm78_vm0, %v175_v22, 0.0 }
 0x187   :  { %178 = vadd.xlane.f32.xlu1 %v177_v24 }
 0x188   :  { %v176_v25 = vmul.f32 %v174_v23, %v174_v23 }
 0x18a   :  { %v180_v26 = vsel %vm78_vm0, %v176_v25, 0.0 }
 0x18b   :  { %181 = vadd.xlane.f32.xlu1 %v180_v26 }
 0x210   :  { %v179_v27 = vpop.xlane.xlu1 %178 }
 0x211   :  { %v183_v28 = vmul.f32 0.03125, %v179_v27 }
 0x213   :  { %v185_v29 = vadd.f32 1e-12, %v183_v28 }
 0x214   :  { %v182_v30 = vpop.xlane.xlu1 %181 }
 0x215   :  { %257 = vrsqrt.f32 %v185_v29  ;;  %v184_v31 = vmul.f32 0.03125, %v182_v30 }
 0x217   :  { %v186_v32 = vadd.f32 1e-12, %v184_v31 }
 0x219   :  { %259 = vrsqrt.f32 %v186_v32 }
 0x222   :  { %v258_v33 = vpop.eup %257 }
 0x223   :  { %v189_v35 = vmul.f32 %v258_v33, %v173_v19 }
 0x225   :  { %v198_v37 = vmul.f32 %v232_v34, %v189_v35 }
 0x226   :  { %v260_v38 = vpop.eup %259 }
 0x227   :  { %v190_v39 = vmul.f32 %v260_v38, %v174_v23  ;;  %v207_v40 = vadd.f32 %v233_v36, %v198_v37 }
 0x229   :  { %v199_v41 = vmul.f32 %v232_v34, %v190_v39  ;;  %209 = vst.msk [vmem:[#allocation8] sm:$0xff] %vm78_vm0, %v207_v40 }
 0x22b   :  { %v208_v42 = vadd.f32 %v233_v36, %v199_v41 }
 0x22d   :  { %210 = vst.msk [vmem:[#allocation8 + $0x8] sm:$0xff] %vm78_vm0, %v208_v42 }
 0x22e   :  { %332 = shalt.err (!%p329_p5)
}
 0x22f   :  { %222 = dma.vmem_to_hbm [thread:$0]  %s217_s17, 256, %s435_s6, [#allocation4], %s349_s26, %s349_s26, %s350_s27  }
 0x230   :  { %345 = dma.done.wait [#allocation4], 256  }
 0x231   :  { %346 = vsyncadd [#allocation4], 4294967040 }
 0x232   :  { %226 = vsyncpa [#allocation3], 1 }
 0x233   :  { %227 = vsyncpa [#allocation6], 1 }
 0x234   :  { %228 = vsyncpa [#allocation4], 1 }

</bundles_post_ra>
